<compile_context>
chip_gen: v7x
topology: tpu7x:2x2x1
jax: 0.10.0
libtpu: 0.0.40
codegen_flags: <defaults>
</compile_context>

<pallas_src>
import jax
import jax.numpy as jnp
import numpy as np
from jax.experimental import pallas as pl
from jax.experimental.pallas import tpu as pltpu


def bilstm_attn_kernel(emb2_ref,     # [S*B, 2E]  (fwd emb || time-reversed emb)
                       w_in_ref,     # [2E, 8H]   combined input-projection weight
                       b_ref,        # [1, 8H]    combined bias
                       whh_ref,      # [2H, 8H]   block-structured recurrent weight
                       dw_ref,       # [2H, Vp]   dense weight (V padded to Vp)
                       db_ref,       # [1, Vp]    dense bias   (padded)
                       logits_ref,   # [B, Vp]
                       hn_ref,       # [2, B, H]
                       cn_ref,       # [2, B, H]
                       gin_scr):     # VMEM scratch [S*B, 8H]
    SB, _ = emb2_ref.shape
    H2, _ = whh_ref.shape             # 2H, 8H
    H = H2 // 2
    B = logits_ref.shape[0]
    S = SB // B
    f32 = jnp.float32

    # ---- 1. hoisted input projection: one MXU pass for all steps & both dirs ----
    # gin[t*B:(t+1)*B, fwd cols] = emb[t]     @ W_ih_f + b_f
    # gin[t*B:(t+1)*B, bwd cols] = emb[S-1-t] @ W_ih_b + b_b
    gin_scr[...] = (jnp.dot(emb2_ref[...], w_in_ref[...],
                            preferred_element_type=f32) + b_ref[...])

    whh = whh_ref[...]                # load recurrent weight once (loop-invariant)
    zeros2 = jnp.zeros((B, H2), f32)

    # ---- 2. fused fwd+bwd recurrence: one 128-lane gate matmul per step ----
    def step(t, carry):
        h, c, pooled = carry
        gin_t = gin_scr[pl.ds(t * B, B), :]                             # [B, 8H]
        gates = gin_t + jnp.dot(h, whh, preferred_element_type=f32)     # [B, 8H]
        i = jax.nn.sigmoid(gates[:, 0 * H2:1 * H2])                     # [B, 2H]
        f = jax.nn.sigmoid(gates[:, 1 * H2:2 * H2])
        g = jnp.tanh(gates[:, 2 * H2:3 * H2])
        o = jax.nn.sigmoid(gates[:, 3 * H2:4 * H2])
        c = f * c + i * g
        h = o * jnp.tanh(c)
        return h, c, pooled + h

    h, c, pooled = jax.lax.fori_loop(0, S, step, (zeros2, zeros2, zeros2),
                                     unroll=True)

    hn_ref[0] = h[:, :H]
    hn_ref[1] = h[:, H:]
    cn_ref[0] = c[:, :H]
    cn_ref[1] = c[:, H:]

    # ---- 3. pooling + dense ----
    # softmax over a trailing size-1 axis is exactly 1.0, so pooling == sum over
    # time (bit-identical to the PyTorch module); attw/attu cannot affect the output.
    # TODO(synk): degenerate softmax(dim=-1) over size-1 axis — flag upstream.
    logits_ref[...] = (jnp.dot(pooled, dw_ref[...], preferred_element_type=f32)
                       + db_ref[...])


def bilstm_attention_forward(tokens, emb_table,
                             wih_f, whh_f, bih_f, bhh_f,
                             wih_b, whh_b, bih_b, bhh_b,
                             attw, attu, dw, db):
    del attw, attu   # mathematically unused: softmax over size-1 axis == 1.0
    B, S = tokens.shape
    E = emb_table.shape[1]
    H = whh_f.shape[1]
    V = dw.shape[0]
    H2, H8 = 2 * H, 8 * H
    Vp = ((V + 127) // 128) * 128          # lane-dense dense-output width
    f32 = jnp.float32

    # Embedding lookup directly in time-major layout.
    # TODO(synk): data-dependent embedding gather stays in plain JAX.
    emb_t = jnp.take(emb_table, tokens.T, axis=0).astype(f32)     # [S, B, E]
    emb2 = jnp.concatenate([emb_t, emb_t[::-1]], axis=-1)         # [S, B, 2E]
    emb2 = emb2.reshape(S * B, 2 * E)

    def interleave_dirs(m_f, m_b):
        # m_f/m_b: [R, 4H] in PyTorch gate order (i,f,g,o) ->
        # [R, 8H] in [i_f,i_b, f_f,f_b, g_f,g_b, o_f,o_b] column order.
        R = m_f.shape[0]
        return jnp.stack([m_f.reshape(R, 4, H), m_b.reshape(R, 4, H)],
                         axis=2).reshape(R, H8)

    zE = jnp.zeros((E, 4 * H), f32)
    zH = jnp.zeros((H, 4 * H), f32)
    w_in = jnp.concatenate([interleave_dirs(wih_f.T.astype(f32), zE),   # rows 0:E  -> fwd gates
                            interleave_dirs(zE, wih_b.T.astype(f32))],  # rows E:2E -> bwd gates
                           axis=0)                                       # [2E, 8H]
    whh_c = jnp.concatenate([interleave_dirs(whh_f.T.astype(f32), zH),  # rows 0:H   (h_f)
                             interleave_dirs(zH, whh_b.T.astype(f32))], # rows H:2H  (h_b)
                            axis=0)                                      # [2H, 8H]
    b_c = interleave_dirs((bih_f + bhh_f)[None, :].astype(f32),
                          (bih_b + bhh_b)[None, :].astype(f32))          # [1, 8H]

    dw_p = jnp.zeros((H2, Vp), f32).at[:, :V].set(dw.T.astype(f32))
    db_p = jnp.zeros((1, Vp), f32).at[:, :V].set(db[None, :].astype(f32))

    args = (emb2, w_in, b_c, whh_c, dw_p, db_p)
    out_shape = (jax.ShapeDtypeStruct((B, Vp), f32),
                 jax.ShapeDtypeStruct((2, B, H), f32),
                 jax.ShapeDtypeStruct((2, B, H), f32))

    fn = pl.pallas_call(
        bilstm_attn_kernel,
        out_shape=out_shape,
        in_specs=[pl.BlockSpec(memory_space=pltpu.MemorySpace.VMEM)] * len(args),
        out_specs=(pl.BlockSpec(memory_space=pltpu.MemorySpace.VMEM),) * 3,
        scratch_shapes=[pltpu.VMEM((S * B, H8), f32)],
    )
    logits_p, hn, cn = fn(*args)
    return logits_p[:, :V], (hn, cn)


def reference_forward(tokens, emb_table,
                      wih_f, whh_f, bih_f, bhh_f,
                      wih_b, whh_b, bih_b, bhh_b,
                      attw, attu, dw, db):
    B, S = tokens.shape
    H = whh_f.shape[1]
    emb = emb_table[tokens]                              # (B, S, E)

    def cell(x, h, c, wih, whh, b):
        gates = x @ wih.T + h @ whh.T + b
        i = jax.nn.sigmoid(gates[:, :H])
        f = jax.nn.sigmoid(gates[:, H:2 * H])
        g = jnp.tanh(gates[:, 2 * H:3 * H])
        o = jax.nn.sigmoid(gates[:, 3 * H:])
        c = f * c + i * g
        h = o * jnp.tanh(c)
        return h, c

    h = jnp.zeros((B, H), jnp.float32); c = jnp.zeros((B, H), jnp.float32)
    outs_f = []
    for t in range(S):
        h, c = cell(emb[:, t], h, c, wih_f, whh_f, bih_f + bhh_f)
        outs_f.append(h)
    hf, cf = h, c

    h = jnp.zeros((B, H), jnp.float32); c = jnp.zeros((B, H), jnp.float32)
    outs_b = [None] * S
    for t in reversed(range(S)):
        h, c = cell(emb[:, t], h, c, wih_b, whh_b, bih_b + bhh_b)
        outs_b[t] = h
    hb, cb = h, c

    out = jnp.concatenate([jnp.stack(outs_f, 1), jnp.stack(outs_b, 1)], axis=-1)  # (B,S,2H)
    uu = jnp.tanh(out @ attw)
    att = uu @ attu                                      # (B, S, 1)
    m = jnp.max(att, axis=-1, keepdims=True)
    e = jnp.exp(att - m)
    score = e / jnp.sum(e, axis=-1, keepdims=True)
    pooled = jnp.sum(out * score, axis=1)
    logits = pooled @ dw.T + db
    return logits, jnp.stack([hf, hb]), jnp.stack([cf, cb])


if __name__ == "__main__":
    V, E, H = 508, 30, 16      # num_embeddings, embedding_dim, hidden_size
    B, S = 2, 8                # batch, seq_len

    key = jax.random.PRNGKey(0)
    ks = jax.random.split(key, 14)

    def uni(k, shape, a):
        return jax.random.uniform(k, shape, jnp.float32, -a, a)

    klstm = 1.0 / float(np.sqrt(H))
    emb_table = jax.random.normal(ks[0], (V, E), jnp.float32)
    wih_f = uni(ks[1], (4 * H, E), klstm); whh_f = uni(ks[2], (4 * H, H), klstm)
    bih_f = uni(ks[3], (4 * H,), klstm);   bhh_f = uni(ks[4], (4 * H,), klstm)
    wih_b = uni(ks[5], (4 * H, E), klstm); whh_b = uni(ks[6], (4 * H, H), klstm)
    bih_b = uni(ks[7], (4 * H,), klstm);   bhh_b = uni(ks[8], (4 * H,), klstm)
    attw = uni(ks[9], (2 * H, 2 * H), 0.1)
    attu = uni(ks[10], (2 * H, 1), 0.1)
    kd = 1.0 / float(np.sqrt(2 * H))
    dw = uni(ks[11], (V, 2 * H), kd)
    db = uni(ks[12], (V,), kd)
    tokens = jax.random.randint(ks[13], (B, S), 0, V, dtype=jnp.int32)

    logits, (hn, cn) = bilstm_attention_forward(
        tokens, emb_table, wih_f, whh_f, bih_f, bhh_f,
        wih_b, whh_b, bih_b, bhh_b, attw, attu, dw, db)
    jax.block_until_ready((logits, hn, cn))

    ref_logits, ref_hn, ref_cn = reference_forward(
        tokens, emb_table, wih_f, whh_f, bih_f, bhh_f,
        wih_b, whh_b, bih_b, bhh_b, attw, attu, dw, db)

    np.testing.assert_allclose(np.asarray(logits), np.asarray(ref_logits),
                               atol=1e-2, rtol=1e-2)
    np.testing.assert_allclose(np.asarray(hn), np.asarray(ref_hn),
                               atol=1e-2, rtol=1e-2)
    np.testing.assert_allclose(np.asarray(cn), np.asarray(ref_cn),
                               atol=1e-2, rtol=1e-2)

    print("KERNEL_OK")
</pallas_src>

<mosaic_0001>
module attributes {stable_mosaic.version = 11 : i64} {
  func.func @bilstm_attn_kernel(%arg0: memref<16x60xf32, #tpu.memory_space<vmem>>, %arg1: memref<60x128xf32, #tpu.memory_space<vmem>>, %arg2: memref<1x128xf32, #tpu.memory_space<vmem>>, %arg3: memref<32x128xf32, #tpu.memory_space<vmem>>, %arg4: memref<32x512xf32, #tpu.memory_space<vmem>>, %arg5: memref<1x512xf32, #tpu.memory_space<vmem>>, %arg6: memref<2x512xf32, #tpu.memory_space<vmem>>, %arg7: memref<2x2x16xf32, #tpu.memory_space<vmem>>, %arg8: memref<2x2x16xf32, #tpu.memory_space<vmem>>, %arg9: memref<16x128xf32, #tpu.memory_space<vmem>>) attributes {dimension_semantics = [], scalar_prefetch = 0 : i64, scratch_operands = 1 : i64, tpu.core_type = #tpu.core_type<tc>} {
    %c0 = arith.constant 0 : index
    %c0_0 = arith.constant 0 : index
    %0 = vector.load %arg0[%c0, %c0_0] : memref<16x60xf32, #tpu.memory_space<vmem>>, vector<16x60xf32>
    %c0_1 = arith.constant 0 : index
    %c0_2 = arith.constant 0 : index
    %1 = vector.load %arg1[%c0_1, %c0_2] : memref<60x128xf32, #tpu.memory_space<vmem>>, vector<60x128xf32>
    %cst = arith.constant dense<0.000000e+00> : vector<16x128xf32>
    %2 = tpu.matmul %0, %1, %cst {dimension_numbers = #tpu.dot_dimension_numbers<[1], [0], [0], [1], [0, 0, 1, 1], [], []>} : vector<16x60xf32>, vector<60x128xf32>, vector<16x128xf32> -> vector<16x128xf32>
    %c0_3 = arith.constant 0 : index
    %c0_4 = arith.constant 0 : index
    %3 = vector.load %arg2[%c0_3, %c0_4] : memref<1x128xf32, #tpu.memory_space<vmem>>, vector<1x128xf32>
    %4 = vector.broadcast %3 : vector<1x128xf32> to vector<16x128xf32>
    %5 = arith.addf %2, %4 : vector<16x128xf32>
    %c0_5 = arith.constant 0 : index
    %c0_6 = arith.constant 0 : index
    %6 = vector.load %arg9[%c0_5, %c0_6] : memref<16x128xf32, #tpu.memory_space<vmem>>, vector<16x128xf32>
    tpu.vector_store %arg9[%c0_5, %c0_6], %5 {strides = array<i32>} : memref<16x128xf32, #tpu.memory_space<vmem>>, vector<16x128xf32>,
    %c0_7 = arith.constant 0 : index
    %c0_8 = arith.constant 0 : index
    %7 = vector.load %arg3[%c0_7, %c0_8] : memref<32x128xf32, #tpu.memory_space<vmem>>, vector<32x128xf32>
    %cst_9 = arith.constant 0.000000e+00 : f32
    %8 = vector.broadcast %cst_9 : f32 to vector<2x32xf32>
    %c0_i32 = arith.constant 0 : i32
    %c2_i32 = arith.constant 2 : i32
    %9 = arith.muli %c0_i32, %c2_i32 : i32
    %10 = arith.index_cast %9 : i32 to index
    %c0_10 = arith.constant 0 : index
    %11 = vector.load %arg9[%10, %c0_10] : memref<16x128xf32, #tpu.memory_space<vmem>>, vector<2x128xf32>
    %cst_11 = arith.constant dense<0.000000e+00> : vector<2x128xf32>
    %12 = tpu.matmul %8, %7, %cst_11 {dimension_numbers = #tpu.dot_dimension_numbers<[1], [0], [0], [1], [0, 0, 1, 1], [], []>} : vector<2x32xf32>, vector<32x128xf32>, vector<2x128xf32> -> vector<2x128xf32>
    %13 = arith.addf %11, %12 : vector<2x128xf32>
    %14 = vector.extract_strided_slice %13 {offsets = [0, 0], sizes = [2, 32], strides = [1, 1]} : vector<2x128xf32> to vector<2x32xf32>
    %15 = arith.negf %14 : vector<2x32xf32>
    %16 = math.exp %15 : vector<2x32xf32>
    %cst_12 = arith.constant 1.000000e+00 : f32
    %17 = vector.broadcast %cst_12 : f32 to vector<2x32xf32>
    %18 = arith.addf %17, %16 : vector<2x32xf32>
    %19 = arith.divf %17, %18 : vector<2x32xf32>
    %20 = vector.extract_strided_slice %13 {offsets = [0, 32], sizes = [2, 32], strides = [1, 1]} : vector<2x128xf32> to vector<2x32xf32>
    %21 = arith.negf %20 : vector<2x32xf32>
    %22 = math.exp %21 : vector<2x32xf32>
    %cst_13 = arith.constant 1.000000e+00 : f32
    %23 = vector.broadcast %cst_13 : f32 to vector<2x32xf32>
    %24 = arith.addf %23, %22 : vector<2x32xf32>
    %25 = arith.divf %23, %24 : vector<2x32xf32>
    %26 = vector.extract_strided_slice %13 {offsets = [0, 64], sizes = [2, 32], strides = [1, 1]} : vector<2x128xf32> to vector<2x32xf32>
    %27 = math.tanh %26 : vector<2x32xf32>
    %28 = vector.extract_strided_slice %13 {offsets = [0, 96], sizes = [2, 32], strides = [1, 1]} : vector<2x128xf32> to vector<2x32xf32>
    %29 = arith.negf %28 : vector<2x32xf32>
    %30 = math.exp %29 : vector<2x32xf32>
    %cst_14 = arith.constant 1.000000e+00 : f32
    %31 = vector.broadcast %cst_14 : f32 to vector<2x32xf32>
    %32 = arith.addf %31, %30 : vector<2x32xf32>
    %33 = arith.divf %31, %32 : vector<2x32xf32>
    %34 = arith.mulf %25, %8 : vector<2x32xf32>
    %35 = arith.mulf %19, %27 : vector<2x32xf32>
    %36 = arith.addf %34, %35 : vector<2x32xf32>
    %37 = math.tanh %36 : vector<2x32xf32>
    %38 = arith.mulf %33, %37 : vector<2x32xf32>
    %39 = arith.addf %8, %38 : vector<2x32xf32>
    %c1_i32 = arith.constant 1 : i32
    %c2_i32_15 = arith.constant 2 : i32
    %40 = arith.muli %c1_i32, %c2_i32_15 : i32
    %41 = arith.index_cast %40 : i32 to index
    %c0_16 = arith.constant 0 : index
    %42 = vector.load %arg9[%41, %c0_16] : memref<16x128xf32, #tpu.memory_space<vmem>>, vector<2x128xf32>
    %cst_17 = arith.constant dense<0.000000e+00> : vector<2x128xf32>
    %43 = tpu.matmul %38, %7, %cst_17 {dimension_numbers = #tpu.dot_dimension_numbers<[1], [0], [0], [1], [0, 0, 1, 1], [], []>} : vector<2x32xf32>, vector<32x128xf32>, vector<2x128xf32> -> vector<2x128xf32>
    %44 = arith.addf %42, %43 : vector<2x128xf32>
    %45 = vector.extract_strided_slice %44 {offsets = [0, 0], sizes = [2, 32], strides = [1, 1]} : vector<2x128xf32> to vector<2x32xf32>
    %46 = arith.negf %45 : vector<2x32xf32>
    %47 = math.exp %46 : vector<2x32xf32>
    %cst_18 = arith.constant 1.000000e+00 : f32
    %48 = vector.broadcast %cst_18 : f32 to vector<2x32xf32>
    %49 = arith.addf %48, %47 : vector<2x32xf32>
    %50 = arith.divf %48, %49 : vector<2x32xf32>
    %51 = vector.extract_strided_slice %44 {offsets = [0, 32], sizes = [2, 32], strides = [1, 1]} : vector<2x128xf32> to vector<2x32xf32>
    %52 = arith.negf %51 : vector<2x32xf32>
    %53 = math.exp %52 : vector<2x32xf32>
    %cst_19 = arith.constant 1.000000e+00 : f32
    %54 = vector.broadcast %cst_19 : f32 to vector<2x32xf32>
    %55 = arith.addf %54, %53 : vector<2x32xf32>
    %56 = arith.divf %54, %55 : vector<2x32xf32>
    %57 = vector.extract_strided_slice %44 {offsets = [0, 64], sizes = [2, 32], strides = [1, 1]} : vector<2x128xf32> to vector<2x32xf32>
    %58 = math.tanh %57 : vector<2x32xf32>
    %59 = vector.extract_strided_slice %44 {offsets = [0, 96], sizes = [2, 32], strides = [1, 1]} : vector<2x128xf32> to vector<2x32xf32>
    %60 = arith.negf %59 : vector<2x32xf32>
    %61 = math.exp %60 : vector<2x32xf32>
    %cst_20 = arith.constant 1.000000e+00 : f32
    %62 = vector.broadcast %cst_20 : f32 to vector<2x32xf32>
    %63 = arith.addf %62, %61 : vector<2x32xf32>
    %64 = arith.divf %62, %63 : vector<2x32xf32>
    %65 = arith.mulf %56, %36 : vector<2x32xf32>
    %66 = arith.mulf %50, %58 : vector<2x32xf32>
    %67 = arith.addf %65, %66 : vector<2x32xf32>
    %68 = math.tanh %67 : vector<2x32xf32>
    %69 = arith.mulf %64, %68 : vector<2x32xf32>
    %70 = arith.addf %39, %69 : vector<2x32xf32>
    %c2_i32_21 = arith.constant 2 : i32
    %c2_i32_22 = arith.constant 2 : i32
    %71 = arith.muli %c2_i32_21, %c2_i32_22 : i32
    %72 = arith.index_cast %71 : i32 to index
    %c0_23 = arith.constant 0 : index
    %73 = vector.load %arg9[%72, %c0_23] : memref<16x128xf32, #tpu.memory_space<vmem>>, vector<2x128xf32>
    %cst_24 = arith.constant dense<0.000000e+00> : vector<2x128xf32>
    %74 = tpu.matmul %69, %7, %cst_24 {dimension_numbers = #tpu.dot_dimension_numbers<[1], [0], [0], [1], [0, 0, 1, 1], [], []>} : vector<2x32xf32>, vector<32x128xf32>, vector<2x128xf32> -> vector<2x128xf32>
    %75 = arith.addf %73, %74 : vector<2x128xf32>
    %76 = vector.extract_strided_slice %75 {offsets = [0, 0], sizes = [2, 32], strides = [1, 1]} : vector<2x128xf32> to vector<2x32xf32>
    %77 = arith.negf %76 : vector<2x32xf32>
    %78 = math.exp %77 : vector<2x32xf32>
    %cst_25 = arith.constant 1.000000e+00 : f32
    %79 = vector.broadcast %cst_25 : f32 to vector<2x32xf32>
    %80 = arith.addf %79, %78 : vector<2x32xf32>
    %81 = arith.divf %79, %80 : vector<2x32xf32>
    %82 = vector.extract_strided_slice %75 {offsets = [0, 32], sizes = [2, 32], strides = [1, 1]} : vector<2x128xf32> to vector<2x32xf32>
    %83 = arith.negf %82 : vector<2x32xf32>
    %84 = math.exp %83 : vector<2x32xf32>
    %cst_26 = arith.constant 1.000000e+00 : f32
    %85 = vector.broadcast %cst_26 : f32 to vector<2x32xf32>
    %86 = arith.addf %85, %84 : vector<2x32xf32>
    %87 = arith.divf %85, %86 : vector<2x32xf32>
    %88 = vector.extract_strided_slice %75 {offsets = [0, 64], sizes = [2, 32], strides = [1, 1]} : vector<2x128xf32> to vector<2x32xf32>
    %89 = math.tanh %88 : vector<2x32xf32>
    %90 = vector.extract_strided_slice %75 {offsets = [0, 96], sizes = [2, 32], strides = [1, 1]} : vector<2x128xf32> to vector<2x32xf32>
    %91 = arith.negf %90 : vector<2x32xf32>
    %92 = math.exp %91 : vector<2x32xf32>
    %cst_27 = arith.constant 1.000000e+00 : f32
    %93 = vector.broadcast %cst_27 : f32 to vector<2x32xf32>
    %94 = arith.addf %93, %92 : vector<2x32xf32>
    %95 = arith.divf %93, %94 : vector<2x32xf32>
    %96 = arith.mulf %87, %67 : vector<2x32xf32>
    %97 = arith.mulf %81, %89 : vector<2x32xf32>
    %98 = arith.addf %96, %97 : vector<2x32xf32>
    %99 = math.tanh %98 : vector<2x32xf32>
    %100 = arith.mulf %95, %99 : vector<2x32xf32>
    %101 = arith.addf %70, %100 : vector<2x32xf32>
    %c3_i32 = arith.constant 3 : i32
    %c2_i32_28 = arith.constant 2 : i32
    %102 = arith.muli %c3_i32, %c2_i32_28 : i32
    %103 = arith.index_cast %102 : i32 to index
    %c0_29 = arith.constant 0 : index
    %104 = vector.load %arg9[%103, %c0_29] : memref<16x128xf32, #tpu.memory_space<vmem>>, vector<2x128xf32>
    %cst_30 = arith.constant dense<0.000000e+00> : vector<2x128xf32>
    %105 = tpu.matmul %100, %7, %cst_30 {dimension_numbers = #tpu.dot_dimension_numbers<[1], [0], [0], [1], [0, 0, 1, 1], [], []>} : vector<2x32xf32>, vector<32x128xf32>, vector<2x128xf32> -> vector<2x128xf32>
    %106 = arith.addf %104, %105 : vector<2x128xf32>
    %107 = vector.extract_strided_slice %106 {offsets = [0, 0], sizes = [2, 32], strides = [1, 1]} : vector<2x128xf32> to vector<2x32xf32>
    %108 = arith.negf %107 : vector<2x32xf32>
    %109 = math.exp %108 : vector<2x32xf32>
    %cst_31 = arith.constant 1.000000e+00 : f32
    %110 = vector.broadcast %cst_31 : f32 to vector<2x32xf32>
    %111 = arith.addf %110, %109 : vector<2x32xf32>
    %112 = arith.divf %110, %111 : vector<2x32xf32>
    %113 = vector.extract_strided_slice %106 {offsets = [0, 32], sizes = [2, 32], strides = [1, 1]} : vector<2x128xf32> to vector<2x32xf32>
    %114 = arith.negf %113 : vector<2x32xf32>
    %115 = math.exp %114 : vector<2x32xf32>
    %cst_32 = arith.constant 1.000000e+00 : f32
    %116 = vector.broadcast %cst_32 : f32 to vector<2x32xf32>
    %117 = arith.addf %116, %115 : vector<2x32xf32>
    %118 = arith.divf %116, %117 : vector<2x32xf32>
    %119 = vector.extract_strided_slice %106 {offsets = [0, 64], sizes = [2, 32], strides = [1, 1]} : vector<2x128xf32> to vector<2x32xf32>
    %120 = math.tanh %119 : vector<2x32xf32>
    %121 = vector.extract_strided_slice %106 {offsets = [0, 96], sizes = [2, 32], strides = [1, 1]} : vector<2x128xf32> to vector<2x32xf32>
    %122 = arith.negf %121 : vector<2x32xf32>
    %123 = math.exp %122 : vector<2x32xf32>
    %cst_33 = arith.constant 1.000000e+00 : f32
    %124 = vector.broadcast %cst_33 : f32 to vector<2x32xf32>
    %125 = arith.addf %124, %123 : vector<2x32xf32>
    %126 = arith.divf %124, %125 : vector<2x32xf32>
    %127 = arith.mulf %118, %98 : vector<2x32xf32>
    %128 = arith.mulf %112, %120 : vector<2x32xf32>
    %129 = arith.addf %127, %128 : vector<2x32xf32>
    %130 = math.tanh %129 : vector<2x32xf32>
    %131 = arith.mulf %126, %130 : vector<2x32xf32>
    %132 = arith.addf %101, %131 : vector<2x32xf32>
    %c4_i32 = arith.constant 4 : i32
    %c2_i32_34 = arith.constant 2 : i32
    %133 = arith.muli %c4_i32, %c2_i32_34 : i32
    %134 = arith.index_cast %133 : i32 to index
    %c0_35 = arith.constant 0 : index
    %135 = vector.load %arg9[%134, %c0_35] : memref<16x128xf32, #tpu.memory_space<vmem>>, vector<2x128xf32>
    %cst_36 = arith.constant dense<0.000000e+00> : vector<2x128xf32>
    %136 = tpu.matmul %131, %7, %cst_36 {dimension_numbers = #tpu.dot_dimension_numbers<[1], [0], [0], [1], [0, 0, 1, 1], [], []>} : vector<2x32xf32>, vector<32x128xf32>, vector<2x128xf32> -> vector<2x128xf32>
    %137 = arith.addf %135, %136 : vector<2x128xf32>
    %138 = vector.extract_strided_slice %137 {offsets = [0, 0], sizes = [2, 32], strides = [1, 1]} : vector<2x128xf32> to vector<2x32xf32>
    %139 = arith.negf %138 : vector<2x32xf32>
    %140 = math.exp %139 : vector<2x32xf32>
    %cst_37 = arith.constant 1.000000e+00 : f32
    %141 = vector.broadcast %cst_37 : f32 to vector<2x32xf32>
    %142 = arith.addf %141, %140 : vector<2x32xf32>
    %143 = arith.divf %141, %142 : vector<2x32xf32>
    %144 = vector.extract_strided_slice %137 {offsets = [0, 32], sizes = [2, 32], strides = [1, 1]} : vector<2x128xf32> to vector<2x32xf32>
    %145 = arith.negf %144 : vector<2x32xf32>
    %146 = math.exp %145 : vector<2x32xf32>
    %cst_38 = arith.constant 1.000000e+00 : f32
    %147 = vector.broadcast %cst_38 : f32 to vector<2x32xf32>
    %148 = arith.addf %147, %146 : vector<2x32xf32>
    %149 = arith.divf %147, %148 : vector<2x32xf32>
    %150 = vector.extract_strided_slice %137 {offsets = [0, 64], sizes = [2, 32], strides = [1, 1]} : vector<2x128xf32> to vector<2x32xf32>
    %151 = math.tanh %150 : vector<2x32xf32>
    %152 = vector.extract_strided_slice %137 {offsets = [0, 96], sizes = [2, 32], strides = [1, 1]} : vector<2x128xf32> to vector<2x32xf32>
    %153 = arith.negf %152 : vector<2x32xf32>
    %154 = math.exp %153 : vector<2x32xf32>
    %cst_39 = arith.constant 1.000000e+00 : f32
    %155 = vector.broadcast %cst_39 : f32 to vector<2x32xf32>
    %156 = arith.addf %155, %154 : vector<2x32xf32>
    %157 = arith.divf %155, %156 : vector<2x32xf32>
    %158 = arith.mulf %149, %129 : vector<2x32xf32>
    %159 = arith.mulf %143, %151 : vector<2x32xf32>
    %160 = arith.addf %158, %159 : vector<2x32xf32>
    %161 = math.tanh %160 : vector<2x32xf32>
    %162 = arith.mulf %157, %161 : vector<2x32xf32>
    %163 = arith.addf %132, %162 : vector<2x32xf32>
    %c5_i32 = arith.constant 5 : i32
    %c2_i32_40 = arith.constant 2 : i32
    %164 = arith.muli %c5_i32, %c2_i32_40 : i32
    %165 = arith.index_cast %164 : i32 to index
    %c0_41 = arith.constant 0 : index
    %166 = vector.load %arg9[%165, %c0_41] : memref<16x128xf32, #tpu.memory_space<vmem>>, vector<2x128xf32>
    %cst_42 = arith.constant dense<0.000000e+00> : vector<2x128xf32>
    %167 = tpu.matmul %162, %7, %cst_42 {dimension_numbers = #tpu.dot_dimension_numbers<[1], [0], [0], [1], [0, 0, 1, 1], [], []>} : vector<2x32xf32>, vector<32x128xf32>, vector<2x128xf32> -> vector<2x128xf32>
    %168 = arith.addf %166, %167 : vector<2x128xf32>
    %169 = vector.extract_strided_slice %168 {offsets = [0, 0], sizes = [2, 32], strides = [1, 1]} : vector<2x128xf32> to vector<2x32xf32>
    %170 = arith.negf %169 : vector<2x32xf32>
    %171 = math.exp %170 : vector<2x32xf32>
    %cst_43 = arith.constant 1.000000e+00 : f32
    %172 = vector.broadcast %cst_43 : f32 to vector<2x32xf32>
    %173 = arith.addf %172, %171 : vector<2x32xf32>
    %174 = arith.divf %172, %173 : vector<2x32xf32>
    %175 = vector.extract_strided_slice %168 {offsets = [0, 32], sizes = [2, 32], strides = [1, 1]} : vector<2x128xf32> to vector<2x32xf32>
    %176 = arith.negf %175 : vector<2x32xf32>
    %177 = math.exp %176 : vector<2x32xf32>
    %cst_44 = arith.constant 1.000000e+00 : f32
    %178 = vector.broadcast %cst_44 : f32 to vector<2x32xf32>
    %179 = arith.addf %178, %177 : vector<2x32xf32>
    %180 = arith.divf %178, %179 : vector<2x32xf32>
    %181 = vector.extract_strided_slice %168 {offsets = [0, 64], sizes = [2, 32], strides = [1, 1]} : vector<2x128xf32> to vector<2x32xf32>
    %182 = math.tanh %181 : vector<2x32xf32>
    %183 = vector.extract_strided_slice %168 {offsets = [0, 96], sizes = [2, 32], strides = [1, 1]} : vector<2x128xf32> to vector<2x32xf32>
    %184 = arith.negf %183 : vector<2x32xf32>
    %185 = math.exp %184 : vector<2x32xf32>
    %cst_45 = arith.constant 1.000000e+00 : f32
    %186 = vector.broadcast %cst_45 : f32 to vector<2x32xf32>
    %187 = arith.addf %186, %185 : vector<2x32xf32>
    %188 = arith.divf %186, %187 : vector<2x32xf32>
    %189 = arith.mulf %180, %160 : vector<2x32xf32>
    %190 = arith.mulf %174, %182 : vector<2x32xf32>
    %191 = arith.addf %189, %190 : vector<2x32xf32>
    %192 = math.tanh %191 : vector<2x32xf32>
    %193 = arith.mulf %188, %192 : vector<2x32xf32>
    %194 = arith.addf %163, %193 : vector<2x32xf32>
    %c6_i32 = arith.constant 6 : i32
    %c2_i32_46 = arith.constant 2 : i32
    %195 = arith.muli %c6_i32, %c2_i32_46 : i32
    %196 = arith.index_cast %195 : i32 to index
    %c0_47 = arith.constant 0 : index
    %197 = vector.load %arg9[%196, %c0_47] : memref<16x128xf32, #tpu.memory_space<vmem>>, vector<2x128xf32>
    %cst_48 = arith.constant dense<0.000000e+00> : vector<2x128xf32>
    %198 = tpu.matmul %193, %7, %cst_48 {dimension_numbers = #tpu.dot_dimension_numbers<[1], [0], [0], [1], [0, 0, 1, 1], [], []>} : vector<2x32xf32>, vector<32x128xf32>, vector<2x128xf32> -> vector<2x128xf32>
    %199 = arith.addf %197, %198 : vector<2x128xf32>
    %200 = vector.extract_strided_slice %199 {offsets = [0, 0], sizes = [2, 32], strides = [1, 1]} : vector<2x128xf32> to vector<2x32xf32>
    %201 = arith.negf %200 : vector<2x32xf32>
    %202 = math.exp %201 : vector<2x32xf32>
    %cst_49 = arith.constant 1.000000e+00 : f32
    %203 = vector.broadcast %cst_49 : f32 to vector<2x32xf32>
    %204 = arith.addf %203, %202 : vector<2x32xf32>
    %205 = arith.divf %203, %204 : vector<2x32xf32>
    %206 = vector.extract_strided_slice %199 {offsets = [0, 32], sizes = [2, 32], strides = [1, 1]} : vector<2x128xf32> to vector<2x32xf32>
    %207 = arith.negf %206 : vector<2x32xf32>
    %208 = math.exp %207 : vector<2x32xf32>
    %cst_50 = arith.constant 1.000000e+00 : f32
    %209 = vector.broadcast %cst_50 : f32 to vector<2x32xf32>
    %210 = arith.addf %209, %208 : vector<2x32xf32>
    %211 = arith.divf %209, %210 : vector<2x32xf32>
    %212 = vector.extract_strided_slice %199 {offsets = [0, 64], sizes = [2, 32], strides = [1, 1]} : vector<2x128xf32> to vector<2x32xf32>
    %213 = math.tanh %212 : vector<2x32xf32>
    %214 = vector.extract_strided_slice %199 {offsets = [0, 96], sizes = [2, 32], strides = [1, 1]} : vector<2x128xf32> to vector<2x32xf32>
    %215 = arith.negf %214 : vector<2x32xf32>
    %216 = math.exp %215 : vector<2x32xf32>
    %cst_51 = arith.constant 1.000000e+00 : f32
    %217 = vector.broadcast %cst_51 : f32 to vector<2x32xf32>
    %218 = arith.addf %217, %216 : vector<2x32xf32>
    %219 = arith.divf %217, %218 : vector<2x32xf32>
    %220 = arith.mulf %211, %191 : vector<2x32xf32>
    %221 = arith.mulf %205, %213 : vector<2x32xf32>
    %222 = arith.addf %220, %221 : vector<2x32xf32>
    %223 = math.tanh %222 : vector<2x32xf32>
    %224 = arith.mulf %219, %223 : vector<2x32xf32>
    %225 = arith.addf %194, %224 : vector<2x32xf32>
    %c7_i32 = arith.constant 7 : i32
    %c2_i32_52 = arith.constant 2 : i32
    %226 = arith.muli %c7_i32, %c2_i32_52 : i32
    %227 = arith.index_cast %226 : i32 to index
    %c0_53 = arith.constant 0 : index
    %228 = vector.load %arg9[%227, %c0_53] : memref<16x128xf32, #tpu.memory_space<vmem>>, vector<2x128xf32>
    %cst_54 = arith.constant dense<0.000000e+00> : vector<2x128xf32>
    %229 = tpu.matmul %224, %7, %cst_54 {dimension_numbers = #tpu.dot_dimension_numbers<[1], [0], [0], [1], [0, 0, 1, 1], [], []>} : vector<2x32xf32>, vector<32x128xf32>, vector<2x128xf32> -> vector<2x128xf32>
    %230 = arith.addf %228, %229 : vector<2x128xf32>
    %231 = vector.extract_strided_slice %230 {offsets = [0, 0], sizes = [2, 32], strides = [1, 1]} : vector<2x128xf32> to vector<2x32xf32>
    %232 = arith.negf %231 : vector<2x32xf32>
    %233 = math.exp %232 : vector<2x32xf32>
    %cst_55 = arith.constant 1.000000e+00 : f32
    %234 = vector.broadcast %cst_55 : f32 to vector<2x32xf32>
    %235 = arith.addf %234, %233 : vector<2x32xf32>
    %236 = arith.divf %234, %235 : vector<2x32xf32>
    %237 = vector.extract_strided_slice %230 {offsets = [0, 32], sizes = [2, 32], strides = [1, 1]} : vector<2x128xf32> to vector<2x32xf32>
    %238 = arith.negf %237 : vector<2x32xf32>
    %239 = math.exp %238 : vector<2x32xf32>
    %cst_56 = arith.constant 1.000000e+00 : f32
    %240 = vector.broadcast %cst_56 : f32 to vector<2x32xf32>
    %241 = arith.addf %240, %239 : vector<2x32xf32>
    %242 = arith.divf %240, %241 : vector<2x32xf32>
    %243 = vector.extract_strided_slice %230 {offsets = [0, 64], sizes = [2, 32], strides = [1, 1]} : vector<2x128xf32> to vector<2x32xf32>
    %244 = math.tanh %243 : vector<2x32xf32>
    %245 = vector.extract_strided_slice %230 {offsets = [0, 96], sizes = [2, 32], strides = [1, 1]} : vector<2x128xf32> to vector<2x32xf32>
    %246 = arith.negf %245 : vector<2x32xf32>
    %247 = math.exp %246 : vector<2x32xf32>
    %cst_57 = arith.constant 1.000000e+00 : f32
    %248 = vector.broadcast %cst_57 : f32 to vector<2x32xf32>
    %249 = arith.addf %248, %247 : vector<2x32xf32>
    %250 = arith.divf %248, %249 : vector<2x32xf32>
    %251 = arith.mulf %242, %222 : vector<2x32xf32>
    %252 = arith.mulf %236, %244 : vector<2x32xf32>
    %253 = arith.addf %251, %252 : vector<2x32xf32>
    %254 = math.tanh %253 : vector<2x32xf32>
    %255 = arith.mulf %250, %254 : vector<2x32xf32>
    %256 = arith.addf %225, %255 : vector<2x32xf32>
    %c8_i32 = arith.constant 8 : i32
    %257 = vector.extract_strided_slice %255 {offsets = [0, 0], sizes = [2, 16], strides = [1, 1]} : vector<2x32xf32> to vector<2x16xf32>
    %c0_58 = arith.constant 0 : index
    %c0_59 = arith.constant 0 : index
    %c0_60 = arith.constant 0 : index
    %258 = vector.load %arg7[%c0_58, %c0_59, %c0_60] : memref<2x2x16xf32, #tpu.memory_space<vmem>>, vector<1x2x16xf32>
    %259 = vector.shape_cast %258 : vector<1x2x16xf32> to vector<2x16xf32>
    %260 = vector.shape_cast %257 : vector<2x16xf32> to vector<1x2x16xf32>
    tpu.vector_store %arg7[%c0_58, %c0_59, %c0_60], %260 {strides = array<i32>} : memref<2x2x16xf32, #tpu.memory_space<vmem>>, vector<1x2x16xf32>,
    %261 = vector.extract_strided_slice %255 {offsets = [0, 16], sizes = [2, 16], strides = [1, 1]} : vector<2x32xf32> to vector<2x16xf32>
    %c1 = arith.constant 1 : index
    %c0_61 = arith.constant 0 : index
    %c0_62 = arith.constant 0 : index
    %262 = vector.load %arg7[%c1, %c0_61, %c0_62] : memref<2x2x16xf32, #tpu.memory_space<vmem>>, vector<1x2x16xf32>
    %263 = vector.shape_cast %262 : vector<1x2x16xf32> to vector<2x16xf32>
    %264 = vector.shape_cast %261 : vector<2x16xf32> to vector<1x2x16xf32>
    tpu.vector_store %arg7[%c1, %c0_61, %c0_62], %264 {strides = array<i32>} : memref<2x2x16xf32, #tpu.memory_space<vmem>>, vector<1x2x16xf32>,
    %265 = vector.extract_strided_slice %253 {offsets = [0, 0], sizes = [2, 16], strides = [1, 1]} : vector<2x32xf32> to vector<2x16xf32>
    %c0_63 = arith.constant 0 : index
    %c0_64 = arith.constant 0 : index
    %c0_65 = arith.constant 0 : index
    %266 = vector.load %arg8[%c0_63, %c0_64, %c0_65] : memref<2x2x16xf32, #tpu.memory_space<vmem>>, vector<1x2x16xf32>
    %267 = vector.shape_cast %266 : vector<1x2x16xf32> to vector<2x16xf32>
    %268 = vector.shape_cast %265 : vector<2x16xf32> to vector<1x2x16xf32>
    tpu.vector_store %arg8[%c0_63, %c0_64, %c0_65], %268 {strides = array<i32>} : memref<2x2x16xf32, #tpu.memory_space<vmem>>, vector<1x2x16xf32>,
    %269 = vector.extract_strided_slice %253 {offsets = [0, 16], sizes = [2, 16], strides = [1, 1]} : vector<2x32xf32> to vector<2x16xf32>
    %c1_66 = arith.constant 1 : index
    %c0_67 = arith.constant 0 : index
    %c0_68 = arith.constant 0 : index
    %270 = vector.load %arg8[%c1_66, %c0_67, %c0_68] : memref<2x2x16xf32, #tpu.memory_space<vmem>>, vector<1x2x16xf32>
    %271 = vector.shape_cast %270 : vector<1x2x16xf32> to vector<2x16xf32>
    %272 = vector.shape_cast %269 : vector<2x16xf32> to vector<1x2x16xf32>
    tpu.vector_store %arg8[%c1_66, %c0_67, %c0_68], %272 {strides = array<i32>} : memref<2x2x16xf32, #tpu.memory_space<vmem>>, vector<1x2x16xf32>,
    %c0_69 = arith.constant 0 : index
    %c0_70 = arith.constant 0 : index
    %273 = vector.load %arg4[%c0_69, %c0_70] : memref<32x512xf32, #tpu.memory_space<vmem>>, vector<32x512xf32>
    %cst_71 = arith.constant dense<0.000000e+00> : vector<2x512xf32>
    %274 = tpu.matmul %256, %273, %cst_71 {dimension_numbers = #tpu.dot_dimension_numbers<[1], [0], [0], [1], [0, 0, 1, 1], [], []>} : vector<2x32xf32>, vector<32x512xf32>, vector<2x512xf32> -> vector<2x512xf32>
    %c0_72 = arith.constant 0 : index
    %c0_73 = arith.constant 0 : index
    %275 = vector.load %arg5[%c0_72, %c0_73] : memref<1x512xf32, #tpu.memory_space<vmem>>, vector<1x512xf32>
    %276 = vector.broadcast %275 : vector<1x512xf32> to vector<2x512xf32>
    %277 = arith.addf %274, %276 : vector<2x512xf32>
    %c0_74 = arith.constant 0 : index
    %c0_75 = arith.constant 0 : index
    %278 = vector.load %arg6[%c0_74, %c0_75] : memref<2x512xf32, #tpu.memory_space<vmem>>, vector<2x512xf32>
    tpu.vector_store %arg6[%c0_74, %c0_75], %277 {strides = array<i32>} : memref<2x512xf32, #tpu.memory_space<vmem>>, vector<2x512xf32>,
    return
  }
}

</mosaic_0001>

<bundles_post_ra>
// kernel: tpu_custom_call.1
= control target key start
LH: loop header
LB: loop body
LE: loop exit
PB: predicated region body
PF: predicated region fallthrough
CT: control target
= control target key end

     0   :  { %14 = vsyncpa [#allocation4], 0  ;;  %s2080_s0 = inlined_call_operand.hbm [shape: f32[16,60], index: 0, kind: input, shape index: {}]   ;;  %s2081_s1 = inlined_call_operand.hbm [shape: f32[60,128], index: 1, kind: input, shape index: {}]   ;;  %s2082_s2 = inlined_call_operand.vmem [shape: f32[1,128], index: 2, kind: input, shape index: {}]   ;;  %s2083_s3 = inlined_call_operand.hbm [shape: f32[32,128], index: 3, kind: input, shape index: {}]   ;;  %s2084_s4 = inlined_call_operand.hbm [shape: f32[32,512], index: 4, kind: input, shape index: {}]   ;;  %s2085_s5 = inlined_call_operand.vmem [shape: f32[1,512], index: 5, kind: input, shape index: {}]   ;;  %s2086_s6 = inlined_call_operand.hbm [shape: f32[2,512], index: 6, kind: output, shape index: {0}]   ;;  %s2087_s7 = inlined_call_operand.hbm [shape: f32[2,2,16], index: 7, kind: output, shape index: {1}]   ;;  %s2088_s8 = inlined_call_operand.hbm [shape: f32[2,2,16], index: 8, kind: output, shape index: {2}]  }
   0x1   :  { %15 = vsyncpa [#allocation7], 0 }
   0x2   :  { %16 = vsyncpa [#allocation10], 0 }
   0x3   :  { %17 = vsyncpa [#allocation5], 0 }
   0x4   :  { %18 = vsyncpa [#allocation13], 0  ;;  %s1793_s27 = smov [#allocation6]   ;;  %s1794_s29 = smov [#allocation3]  }
   0x5   :  { %s36_s28 = sshll.u32 %s1793_s27, 4  ;;  %s24_s30 = sshll.u32 %s1794_s29, 4  ;;  %s37_s28 = int_to_ptr.vmem [resolvable:$true] %s36_s28  ;;  %s1859_s30 = int_to_ptr.vmem [resolvable:$true] %s24_s30 }
   0x6   :  { %s1629_s11 = scalar_lea.hbm %s2081_s1, 1024 }
   0x7   :  { %p1630_p0 = scmp.ne.s32.totalorder %s2081_s1, %s1629_s11  ;;  %p1633_p1 = scmp.lt.u32.totalorder %s1629_s11, %s2081_s1 }
   0x9   :  { %p1635_p2 = pnand %p1633_p1, %p1630_p0 }
   0xb   :  { %1638 = shalt.err (!%p1635_p2)
}
   0xc   :  { %s1639_s16 = scalar_lea.vmem %s37_s28, 1024  ;;  %p1644_p4 = scmp.lt.s32.totalorder %s37_s28, %s37_s28 }
   0xd   :  { %p1640_p3 = scmp.ne.s32.totalorder %s37_s28, %s1639_s16  ;;  %p1645_p5 = scmp.lt.s32.totalorder %s1639_s16, %s1639_s16 }
   0xf   :  { %p1646_p6 = por %p1645_p5, %p1644_p4 }
  0x11   :  { %p1647_p7 = pnand %p1646_p6, %p1640_p3 }
  0x13   :  { %1650 = shalt.err (!%p1647_p7)
}
  0x14   :  { %s1795_s17 = smov 128   ;;  %s1796_s18 = smov 8  }
  0x15   :  { %42 = dma.hbm_to_vmem [thread:$0]  %s2081_s1, 1024, %s37_s28, [#allocation7], %s1795_s17, %s1795_s17, %s1796_s18  }
  0x16   :  { %s1651_s23 = scalar_lea.hbm %s2080_s0, 256 }
  0x17   :  { %p1652_p8 = scmp.ne.s32.totalorder %s2080_s0, %s1651_s23  ;;  %p1655_p9 = scmp.lt.u32.totalorder %s1651_s23, %s2080_s0 }
  0x19   :  { %p1657_p10 = pnand %p1655_p9, %p1652_p8 }
  0x1b   :  { %1660 = shalt.err (!%p1657_p10)
}
  0x1c   :  { %s1661_s29 = scalar_lea.vmem %s1859_s30, 256  ;;  %p1666_p12 = scmp.lt.s32.totalorder %s1859_s30, %s1859_s30 }
  0x1d   :  { %p1662_p11 = scmp.ne.s32.totalorder %s1859_s30, %s1661_s29  ;;  %p1667_p13 = scmp.lt.s32.totalorder %s1661_s29, %s1661_s29 }
  0x1f   :  { %p1668_p0 = por %p1667_p13, %p1666_p12 }
  0x21   :  { %p1669_p1 = pnand %p1668_p0, %p1662_p11 }
  0x23   :  { %1672 = shalt.err (!%p1669_p1)
}
  0x24   :  { %30 = dma.hbm_to_vmem [thread:$0]  %s2080_s0, 256, %s1859_s30, [#allocation4], %s1795_s17, %s1795_s17, %s1796_s18  }
  0x25   :  { %s1797_s9 = smov [#allocation8]   ;;  %s1798_s11 = smov [#allocation9]  }
  0x26   :  { %s50_s10 = sshll.u32 %s1797_s9, 4  ;;  %s62_s12 = sshll.u32 %s1798_s11, 4  ;;  %s51_s10 = int_to_ptr.vmem [resolvable:$true] %s50_s10  ;;  %s1896_s12 = int_to_ptr.vmem [resolvable:$true] %s62_s12 }
  0x27   :  { %s1673_s15 = scalar_lea.hbm %s2083_s3, 512 }
  0x28   :  { %p1674_p2 = scmp.ne.s32.totalorder %s2083_s3, %s1673_s15  ;;  %p1677_p3 = scmp.lt.u32.totalorder %s1673_s15, %s2083_s3 }
  0x2a   :  { %p1679_p4 = pnand %p1677_p3, %p1674_p2 }
  0x2c   :  { %1682 = shalt.err (!%p1679_p4)
}
  0x2d   :  { %s1683_s0 = scalar_lea.vmem %s51_s10, 512  ;;  %p1688_p6 = scmp.lt.s32.totalorder %s51_s10, %s51_s10 }
  0x2e   :  { %p1684_p5 = scmp.ne.s32.totalorder %s51_s10, %s1683_s0  ;;  %p1689_p7 = scmp.lt.s32.totalorder %s1683_s0, %s1683_s0 }
  0x30   :  { %p1690_p8 = por %p1689_p7, %p1688_p6 }
  0x32   :  { %p1691_p9 = pnand %p1690_p8, %p1684_p5 }
  0x34   :  { %1694 = shalt.err (!%p1691_p9)
}
  0x35   :  { %56 = dma.hbm_to_vmem [thread:$0]  %s2083_s3, 512, %s51_s10, [#allocation7], %s1795_s17, %s1795_s17, %s1796_s18  }
  0x36   :  { %s1695_s25 = scalar_lea.hbm %s2084_s4, 2048 }
  0x37   :  { %p1696_p10 = scmp.ne.s32.totalorder %s2084_s4, %s1695_s25  ;;  %p1699_p11 = scmp.lt.u32.totalorder %s1695_s25, %s2084_s4 }
  0x39   :  { %p1701_p12 = pnand %p1699_p11, %p1696_p10 }
  0x3b   :  { %1704 = shalt.err (!%p1701_p12)
}
  0x3c   :  { %s1705_s28 = scalar_lea.vmem %s1896_s12, 2048  ;;  %p1710_p0 = scmp.lt.s32.totalorder %s1896_s12, %s1896_s12 }
  0x3d   :  { %p1706_p13 = scmp.ne.s32.totalorder %s1896_s12, %s1705_s28  ;;  %p1711_p1 = scmp.lt.s32.totalorder %s1705_s28, %s1705_s28 }
  0x3f   :  { %p1712_p2 = por %p1711_p1, %p1710_p0 }
  0x41   :  { %p1713_p3 = pnand %p1712_p2, %p1706_p13 }
  0x43   :  { %1716 = shalt.err (!%p1713_p3)
}
  0x44   :  { %s1799_s3 = smov 512   ;;  %s1800_s17 = smov 32  }
  0x45   :  { %68 = dma.hbm_to_vmem [thread:$0]  %s2084_s4, 2048, %s1896_s12, [#allocation10], %s1799_s3, %s1799_s3, %s1800_s17  }
  0x46   :  { %1783 = dma.done.wait [#allocation4], 256  }
  0x47   :  { %1784 = vsyncadd [#allocation4], 4294967040 }
  0x48   :  { %1785 = dma.done.wait [#allocation7], 1536  }
  0x49   :  { %1786 = vsyncadd [#allocation7], 4294965760 }
  0x4a   :  { %1787 = dma.done.wait [#allocation10], 2048  }
  0x4b   :  { %1788 = vsyncadd [#allocation10], 4294965248  ;;  %v1801_v0 = vmov 0.0|0.0   ;;  %vm1802_vm0 = vmmov 0   ;;  %v1803_v1 = vmov 0.0   ;;  %v85_v2 = vld [vmem:[#allocation6] sm:$0xff] }
  0x4c   :  { %1480 = vmatprep.subr.bf16.mxu1 %v1801_v0  ;;  %1382 = vmatprep.mubr.msk.f32.mxu1 %vm1802_vm0, %v1803_v1  ;;  %v86_v3 = vld [vmem:[#allocation6 + $0x8] sm:$0xff]  ;;  %v87_v4 = vld [vmem:[#allocation6 + $0x10] sm:$0xff]  ;;  %vm100_vm1 = vcmask 490496   ;;  %v88_v6 = vld [vmem:[#allocation6 + $0x18] sm:$0xff]  ;;  %vm107_vm2 = vcmask 1043456   ;;  %vm1804_vm3 = vmmov 1  }
  0x4d   :  { %v1462_v5 = vpack.c.bf16 %v86_v3, %v85_v2  ;;  %v1466_v7 = vpack.c.bf16 %v88_v6, %v87_v4  ;;  %v89_v8 = vld [vmem:[#allocation6 + $0x20] sm:$0xff]  ;;  %v90_v9 = vld [vmem:[#allocation6 + $0x28] sm:$0xff]  ;;  %v83_v10 = vld [vmem:[#allocation3] sm:$0xff]  ;;  %s1805_s11 = smov 64   ;;  %vm193_vm5 = vcmask 261120   ;;  %s1807_s12 = smov 16  }
  0x4e   :  { %1371 = vmatprep.mubr.msk.f32.mxu0 %vm100_vm1, %v83_v10  ;;  %v188_v11 = vld [vmem:[#allocation8] sm:$0xff]  ;;  %v189_v12 = vld [vmem:[#allocation8 + $0x8] sm:$0xff]  ;;  %v190_v14 = vld [vmem:[#allocation8 + $0x10] sm:$0xff]  ;;  %v1470_v16 = vpack.c.bf16 %v90_v9, %v89_v8  ;;  %s1808_s13 = smov 80   ;;  %vm1011_vm6 = vcmask 123904   ;;  %s1809_s14 = smov [#allocation12]  }
  0x4f   :  { %1463 = vmatprep.subr.bf16.mxu0 %v1462_v5  ;;  %v1935_v13 = vpack.c.bf16 %v189_v12, %v188_v11  ;;  %v191_v15 = vld [vmem:[#allocation8 + $0x18] sm:$0xff]  ;;  %v91_v17 = vld [vmem:[#allocation6 + $0x30] sm:$0xff]  ;;  %vm1475_vm4 = vmpackc.low %vm107_vm2, %vm1804_vm3  ;;  %s1251_s15 = sshll.u32 %s1809_s14, 4  ;;  %s1252_s15 = int_to_ptr.vmem [resolvable:$true] %s1251_s15 }
  0x50   :  { %1465 = vmatpush3.bf16.msra.mxu0 %v1462_v5  ;;  %v92_v18 = vld [vmem:[#allocation6 + $0x38] sm:$0xf]  ;;  %v1938_v19 = vpack.c.bf16 %v191_v15, %v190_v14  ;;  %v1284_v24 = vld [vmem:[%s2082_s2] ss:$0 sm:$0xff]  ;;  %s1806_s2 = smov 96   ;;  %s1717_s16 = scalar_lea.vmem %s1252_s15, 64 }
  0x51   :  { %1467 = vmatprep.subr.bf16.mxu0 %v1466_v7  ;;  %1482 = vmatpush3.bf16.msra.mxu1 %v1935_v13  ;;  %v1474_v20 = vpack.c.bf16 %v92_v18, %v91_v17  ;;  %v84_v21 = vld [vmem:[#allocation3 + $0x8] sm:$0xff]  ;;  %p1718_p4 = scmp.ne.s32.totalorder %s1252_s15, %s1717_s16  ;;  %p1722_p5 = scmp.lt.s32.totalorder %s1252_s15, %s1252_s15 }
  0x52   :  { %1483 = vmatprep.subr.bf16.mxu1 %v1801_v0  ;;  %p1723_p6 = scmp.lt.s32.totalorder %s1717_s16, %s1717_s16 }
  0x54   :  { %1469 = vmatpush3.bf16.msra.mxu0 %v1466_v7  ;;  %p1724_p7 = por %p1723_p6, %p1722_p5 }
  0x55   :  { %1471 = vmatprep.subr.bf16.mxu0 %v1470_v16  ;;  %1485 = vmatpush3.bf16.msra.mxu1 %v1938_v19 }
  0x56   :  { %1486 = vmatprep.subr.bf16.mxu1 %v1801_v0  ;;  %p1725_p8 = pnand %p1724_p7, %p1718_p4 }
  0x58   :  { %1473 = vmatpush3.bf16.msra.mxu0 %v1470_v16  ;;  %1383 = vmatmul.mubr.f32.vlgmr.msra.gmra.mrb[0].mxu1 %v1803_v1 }
  0x59   :  { %1476 = vmatprep.subr.msk.bf16.mxu0 %vm1475_vm4, %v1474_v20  ;;  %1488 = vmatpush3.bf16.msra.mxu1 %v1935_v13 }
  0x5a   :  { %1393 = vmatprep.mubr.msk.f32.mxu1 %vm1802_vm0, %v1803_v1  ;;  %1489 = vmatprep.subr.bf16.mxu1 %v1801_v0 }
  0x5c   :  { %1479 = vmatpush3.bf16.msk.msra.mxu0 %vm1475_vm4, %v1474_v20 }
  0x5d   :  { %1492 = vmatprep.subr.bf16.mxu0 %v1801_v0  ;;  %1491 = vmatpush3.bf16.msra.mxu1 %v1938_v19 }
  0x5e   :  { %1498 = vmatprep.subr.bf16.mxu1 %v1801_v0 }
  0x5f   :  { %1372 = vmatmul.mubr.msk.f32.vlgmr.msra.gmra.mrb[0].mxu0 %vm100_vm1, %v84_v21 }
  0x60   :  { %1494 = vmatpush3.bf16.msra.mxu0 %v1935_v13  ;;  %1404 = vmatprep.mubr.msk.f32.mxu0 %vm1802_vm0, %v1803_v1 }
  0x61   :  { %1495 = vmatprep.subr.bf16.mxu0 %v1801_v0 }
  0x64   :  { %1497 = vmatpush3.bf16.msra.mxu0 %v1938_v19 }
  0x65   :  { %1504 = vmatprep.subr.bf16.mxu0 %v1801_v0 }
 0x12b   :  { %v263_v22 = vpop.f32.mrb[0].mxu1 }
 0x12c   :  { %v1384_v23 = vpop.f32.mrb[1].mxu1 }
 0x132   :  { %v1373_v25 = vpop.f32.mrb[0].mxu0 }
 0x133   :  { %v183_v26 = vadd.f32 %v1373_v25, %v1284_v24  ;;  %v177_v27 = vpop.f32.mrb[1].mxu0 }
 0x134   :  { %v178_v28 = vadd.f32 %v1284_v24, %v177_v27 }
 0x135   :  { %187 = vst [vmem:[#allocation2 + $0x8] sm:$0xff] %v183_v26 }
 0x136   :  { %186 = vst [vmem:[#allocation2] sm:$0xff] %v178_v28 }
 0x13d   :  { %v192_v29 = vld [vmem:[#allocation2] sm:$0x3]  ;;  %v293_v45 = vld [vmem:[#allocation2 + $0x2] sm:$0x3]  ;;  %v395_v63 = vld [vmem:[#allocation2 + $0x4] sm:$0x3] }
 0x13e   :  { %v267_v30 = vadd.f32 %v263_v22, %v192_v29  ;;  %v497_v23 = vld [vmem:[#allocation2 + $0x6] sm:$0x3] }
 0x140   :  { %1565 = vtanh.f32 %v267_v30  ;;  %v1288_v32 = vmul.f32 -1.442695, %v267_v30 }
 0x142   :  { %1567 = vpow2.f32 %v1288_v32 }
 0x14a   :  { %v1566_v31 = vpop.eup %1565 }
 0x14b   :  { %277 = vrot.lane.b32.xlu0 %v1566_v31, %s1805_s11 }
 0x14c   :  { %v1568_v33 = vpop.eup %1567 }
 0x14d   :  { %v271_v34 = vadd.f32 1.0, %v1568_v33 }
 0x14f   :  { %1569 = vrcp.f32 %v271_v34 }
 0x159   :  { %v1570_v35 = vpop.eup %1569 }
 0x15a   :  { %v275_v38 = vmul.f32 0.0, %v1570_v35 }
 0x1bd   :  { %v278_v36 = vpop.permute.xlu0 %277 }
 0x1be   :  { %v280_v37 = vmul.f32 %v1570_v35, %v278_v36 }
 0x1c0   :  { %282 = vrot.lane.b32.xlu0 %v280_v37, %s1800_s17 }
 0x232   :  { %v283_v39 = vpop.permute.xlu0 %282 }
 0x233   :  { %v285_v40 = vadd.f32 %v283_v39, %v275_v38 }
 0x235   :  { %1571 = vtanh.f32 %v285_v40 }
 0x23f   :  { %v1572_v41 = vpop.eup %1571 }
 0x240   :  { %288 = vrot.lane.b32.xlu1 %v1572_v41, %s1805_s11 }
 0x2b2   :  { %v289_v42 = vpop.permute.xlu1 %288 }
 0x2b3   :  { %v1964_v43 = vmul.f32 %v1570_v35, %v289_v42  ;;  %v599_v42 = vld [vmem:[#allocation2 + $0x8] sm:$0x3] }
 0x2b5   :  { %295 = vrot.lane.b32.xlu1 %v1964_v43, %s1800_s17 }
 0x327   :  { %v296_v44 = vpop.permute.xlu1 %295 }
 0x328   :  { %1394 = vmatmul.mubr.msk.f32.vlgmr.msra.gmra.mrb[2].mxu1 %vm193_vm5, %v296_v44 }
 0x329   :  { %1500 = vmatpush3.bf16.msra.mxu1 %v1935_v13  ;;  %1415 = vmatprep.mubr.msk.f32.mxu1 %vm1802_vm0, %v1803_v1 }
 0x32a   :  { %1501 = vmatprep.subr.bf16.mxu1 %v1801_v0 }
 0x32d   :  { %1503 = vmatpush3.bf16.msra.mxu1 %v1938_v19 }
 0x32e   :  { %1510 = vmatprep.subr.bf16.mxu1 %v1801_v0 }
 0x3fb   :  { %v365_v46 = vpop.f32.mrb[2].mxu1 }
 0x3fc   :  { %v369_v47 = vadd.f32 %v365_v46, %v293_v45  ;;  %v1395_v48 = vpop.f32.mrb[3].mxu1 }
 0x3fe   :  { %1573 = vtanh.f32 %v369_v47  ;;  %v1290_v50 = vmul.f32 -1.442695, %v369_v47 }
 0x400   :  { %1575 = vpow2.f32 %v1290_v50 }
 0x408   :  { %v1574_v49 = vpop.eup %1573 }
 0x409   :  { %379 = vrot.lane.b32.xlu0 %v1574_v49, %s1805_s11 }
 0x40a   :  { %v1576_v51 = vpop.eup %1575 }
 0x40b   :  { %v373_v52 = vadd.f32 1.0, %v1576_v51 }
 0x40d   :  { %1577 = vrcp.f32 %v373_v52 }
 0x417   :  { %v1578_v53 = vpop.eup %1577 }
 0x418   :  { %v377_v56 = vmul.f32 %v1578_v53, %v285_v40 }
 0x47b   :  { %v380_v54 = vpop.permute.xlu0 %379 }
 0x47c   :  { %v382_v55 = vmul.f32 %v1578_v53, %v380_v54 }
 0x47e   :  { %384 = vrot.lane.b32.xlu1 %v382_v55, %s1800_s17 }
 0x4f0   :  { %v385_v57 = vpop.permute.xlu1 %384 }
 0x4f1   :  { %v387_v58 = vadd.f32 %v385_v57, %v377_v56 }
 0x4f3   :  { %1579 = vtanh.f32 %v387_v58 }
 0x4fd   :  { %v1580_v59 = vpop.eup %1579 }
 0x4fe   :  { %390 = vrot.lane.b32.xlu0 %v1580_v59, %s1805_s11 }
 0x570   :  { %v391_v60 = vpop.permute.xlu0 %390 }
 0x571   :  { %v393_v61 = vmul.f32 %v1578_v53, %v391_v60 }
 0x573   :  { %397 = vrot.lane.b32.xlu1 %v393_v61, %s1800_s17  ;;  %v394_v18 = vadd.f32 %v393_v61, %v1964_v43  ;;  %v701_v61 = vld [vmem:[#allocation2 + $0xa] sm:$0x3] }
 0x5e5   :  { %v398_v62 = vpop.permute.xlu1 %397 }
 0x5e6   :  { %1405 = vmatmul.mubr.msk.f32.vlgmr.msra.gmra.mrb[2].mxu0 %vm193_vm5, %v398_v62 }
 0x5e7   :  { %1506 = vmatpush3.bf16.msra.mxu0 %v1935_v13  ;;  %1426 = vmatprep.mubr.msk.f32.mxu0 %vm1802_vm0, %v1803_v1 }
 0x5e8   :  { %1507 = vmatprep.subr.bf16.mxu0 %v1801_v0 }
 0x5eb   :  { %1509 = vmatpush3.bf16.msra.mxu0 %v1938_v19 }
 0x5ec   :  { %1516 = vmatprep.subr.bf16.mxu0 %v1801_v0 }
 0x6b9   :  { %v467_v2 = vpop.f32.mrb[2].mxu0 }
 0x6ba   :  { %v471_v3 = vadd.f32 %v467_v2, %v395_v63  ;;  %v1406_v4 = vpop.f32.mrb[3].mxu0 }
 0x6bc   :  { %1581 = vtanh.f32 %v471_v3  ;;  %v1292_v6 = vmul.f32 -1.442695, %v471_v3 }
 0x6be   :  { %1583 = vpow2.f32 %v1292_v6 }
 0x6c6   :  { %v1582_v5 = vpop.eup %1581 }
 0x6c7   :  { %481 = vrot.lane.b32.xlu0 %v1582_v5, %s1805_s11 }
 0x6c8   :  { %v1584_v7 = vpop.eup %1583 }
 0x6c9   :  { %v475_v8 = vadd.f32 1.0, %v1584_v7 }
 0x6cb   :  { %1585 = vrcp.f32 %v475_v8 }
 0x6d5   :  { %v1586_v9 = vpop.eup %1585 }
 0x6d6   :  { %v479_v12 = vmul.f32 %v1586_v9, %v387_v58 }
 0x739   :  { %v482_v10 = vpop.permute.xlu0 %481 }
 0x73a   :  { %v484_v11 = vmul.f32 %v1586_v9, %v482_v10 }
 0x73c   :  { %486 = vrot.lane.b32.xlu1 %v484_v11, %s1800_s17 }
 0x7ae   :  { %v487_v14 = vpop.permute.xlu1 %486 }
 0x7af   :  { %v489_v15 = vadd.f32 %v487_v14, %v479_v12 }
 0x7b1   :  { %1587 = vtanh.f32 %v489_v15 }
 0x7bb   :  { %v1588_v16 = vpop.eup %1587 }
 0x7bc   :  { %492 = vrot.lane.b32.xlu0 %v1588_v16, %s1805_s11  ;;  %v803_v16 = vld [vmem:[#allocation2 + $0xc] sm:$0x3] }
 0x82e   :  { %v493_v17 = vpop.permute.xlu0 %492 }
 0x82f   :  { %v495_v20 = vmul.f32 %v1586_v9, %v493_v17 }
 0x831   :  { %v496_v21 = vadd.f32 %v495_v20, %v394_v18  ;;  %499 = vrot.lane.b32.xlu1 %v495_v20, %s1800_s17 }
 0x8a3   :  { %v500_v22 = vpop.permute.xlu1 %499 }
 0x8a4   :  { %1416 = vmatmul.mubr.msk.f32.vlgmr.msra.gmra.mrb[4].mxu1 %vm193_vm5, %v500_v22 }
 0x8a5   :  { %1512 = vmatpush3.bf16.msra.mxu1 %v1935_v13  ;;  %1437 = vmatprep.mubr.msk.f32.mxu1 %vm1802_vm0, %v1803_v1 }
 0x8a6   :  { %1513 = vmatprep.subr.bf16.mxu1 %v1801_v0 }
 0x8a9   :  { %1515 = vmatpush3.bf16.msra.mxu1 %v1938_v19 }
 0x8aa   :  { %1522 = vmatprep.subr.bf16.mxu1 %v1801_v0 }
 0x977   :  { %v569_v24 = vpop.f32.mrb[4].mxu1 }
 0x978   :  { %v573_v25 = vadd.f32 %v569_v24, %v497_v23  ;;  %v1417_v26 = vpop.f32.mrb[5].mxu1 }
 0x97a   :  { %1589 = vtanh.f32 %v573_v25  ;;  %v1294_v28 = vmul.f32 -1.442695, %v573_v25 }
 0x97c   :  { %1591 = vpow2.f32 %v1294_v28 }
 0x984   :  { %v1590_v27 = vpop.eup %1589 }
 0x985   :  { %583 = vrot.lane.b32.xlu0 %v1590_v27, %s1805_s11 }
 0x986   :  { %v1592_v29 = vpop.eup %1591 }
 0x987   :  { %v577_v30 = vadd.f32 1.0, %v1592_v29 }
 0x989   :  { %1593 = vrcp.f32 %v577_v30 }
 0x993   :  { %v1594_v31 = vpop.eup %1593 }
 0x994   :  { %v581_v34 = vmul.f32 %v1594_v31, %v489_v15 }
 0x9f7   :  { %v584_v32 = vpop.permute.xlu0 %583 }
 0x9f8   :  { %v586_v33 = vmul.f32 %v1594_v31, %v584_v32 }
 0x9fa   :  { %588 = vrot.lane.b32.xlu1 %v586_v33, %s1800_s17 }
 0xa6c   :  { %v589_v35 = vpop.permute.xlu1 %588 }
 0xa6d   :  { %v591_v36 = vadd.f32 %v589_v35, %v581_v34 }
 0xa6f   :  { %1595 = vtanh.f32 %v591_v36 }
 0xa79   :  { %v1596_v37 = vpop.eup %1595 }
 0xa7a   :  { %594 = vrot.lane.b32.xlu0 %v1596_v37, %s1805_s11 }
 0xaec   :  { %v595_v38 = vpop.permute.xlu0 %594 }
 0xaed   :  { %v597_v39 = vmul.f32 %v1594_v31, %v595_v38 }
 0xaef   :  { %v598_v40 = vadd.f32 %v597_v39, %v496_v21  ;;  %601 = vrot.lane.b32.xlu1 %v597_v39, %s1800_s17 }
 0xb61   :  { %v602_v41 = vpop.permute.xlu1 %601 }
 0xb62   :  { %1427 = vmatmul.mubr.msk.f32.vlgmr.msra.gmra.mrb[4].mxu0 %vm193_vm5, %v602_v41 }
 0xb63   :  { %1518 = vmatpush3.bf16.msra.mxu0 %v1935_v13  ;;  %1448 = vmatprep.mubr.msk.f32.mxu0 %vm1802_vm0, %v1803_v1 }
 0xb64   :  { %1519 = vmatprep.subr.bf16.mxu0 %v1801_v0 }
 0xb67   :  { %1521 = vmatpush3.bf16.msra.mxu0 %v1938_v19 }
 0xc35   :  { %v671_v43 = vpop.f32.mrb[4].mxu0 }
 0xc36   :  { %v675_v44 = vadd.f32 %v671_v43, %v599_v42  ;;  %v1428_v45 = vpop.f32.mrb[5].mxu0 }
 0xc38   :  { %1597 = vtanh.f32 %v675_v44  ;;  %v1296_v47 = vmul.f32 -1.442695, %v675_v44 }
 0xc3a   :  { %1599 = vpow2.f32 %v1296_v47 }
 0xc42   :  { %v1598_v46 = vpop.eup %1597 }
 0xc43   :  { %685 = vrot.lane.b32.xlu0 %v1598_v46, %s1805_s11 }
 0xc44   :  { %v1600_v48 = vpop.eup %1599 }
 0xc45   :  { %v679_v49 = vadd.f32 1.0, %v1600_v48 }
 0xc47   :  { %1601 = vrcp.f32 %v679_v49 }
 0xc51   :  { %v1602_v50 = vpop.eup %1601 }
 0xc52   :  { %v683_v53 = vmul.f32 %v1602_v50, %v591_v36  ;;  %v905_v36 = vld [vmem:[#allocation2 + $0xe] sm:$0x3] }
 0xcb5   :  { %v686_v51 = vpop.permute.xlu0 %685 }
 0xcb6   :  { %v688_v52 = vmul.f32 %v1602_v50, %v686_v51  ;;  %v1033_v51 = vld [vmem:[#allocation9 + $0x28] sm:$0xff] }
 0xcb8   :  { %690 = vrot.lane.b32.xlu1 %v688_v52, %s1800_s17  ;;  %v1031_v52 = vld [vmem:[#allocation9 + $0x18] sm:$0xff] }
 0xd2a   :  { %v691_v54 = vpop.permute.xlu1 %690 }
 0xd2b   :  { %v693_v55 = vadd.f32 %v691_v54, %v683_v53  ;;  %v1035_v54 = vld [vmem:[#allocation9 + $0x38] sm:$0xff] }
 0xd2d   :  { %1603 = vtanh.f32 %v693_v55 }
 0xd37   :  { %v1604_v56 = vpop.eup %1603 }
 0xd38   :  { %696 = vrot.lane.b32.xlu0 %v1604_v56, %s1805_s11  ;;  %v1032_v56 = vld [vmem:[#allocation9 + $0x20] sm:$0xff] }
 0xdaa   :  { %v697_v57 = vpop.permute.xlu0 %696 }
 0xdab   :  { %v699_v58 = vmul.f32 %v1602_v50, %v697_v57  ;;  %v1029_v50 = vld [vmem:[#allocation9 + $0x8] sm:$0xff]  ;;  %v1536_v57 = vpack.c.bf16 %v1035_v54, %v1031_v52 }
 0xdac   :  { %v1528_v53 = vpack.c.bf16 %v1033_v51, %v1029_v50 }
 0xdad   :  { %v700_v59 = vadd.f32 %v699_v58, %v598_v40  ;;  %703 = vrot.lane.b32.xlu1 %v699_v58, %s1800_s17 }
 0xdae   :  { %1529 = vmatprep.subr.bf16.mxu0 %v1528_v53 }
 0xe1f   :  { %v704_v60 = vpop.permute.xlu1 %703 }
 0xe20   :  { %1438 = vmatmul.mubr.msk.f32.vlgmr.msra.gmra.mrb[6].mxu1 %vm193_vm5, %v704_v60  ;;  %v1034_v60 = vld [vmem:[#allocation9 + $0x30] sm:$0xff] }
 0xe21   :  { %1524 = vmatpush3.bf16.msra.mxu1 %v1935_v13  ;;  %1459 = vmatprep.mubr.msk.f32.mxu1 %vm1802_vm0, %v1803_v1 }
 0xe22   :  { %1525 = vmatprep.subr.bf16.mxu1 %v1801_v0 }
 0xe25   :  { %1527 = vmatpush3.bf16.msra.mxu1 %v1938_v19 }
 0xe26   :  { %1537 = vmatprep.subr.bf16.mxu1 %v1536_v57 }
 0xef3   :  { %v773_v62 = vpop.f32.mrb[6].mxu1 }
 0xef4   :  { %v777_v63 = vadd.f32 %v773_v62, %v701_v61  ;;  %v1439_v2 = vpop.f32.mrb[7].mxu1  ;;  %v1037_v61 = vld [vmem:[#allocation9 + $0x48] sm:$0xff] }
 0xef5   :  { %v1039_v2 = vld [vmem:[#allocation9 + $0x58] sm:$0xff] }
 0xef6   :  { %1605 = vtanh.f32 %v777_v63  ;;  %v1298_v4 = vmul.f32 -1.442695, %v777_v63  ;;  %v1041_v63 = vld [vmem:[#allocation9 + $0x68] sm:$0xff] }
 0xef8   :  { %1607 = vpow2.f32 %v1298_v4  ;;  %v1532_v4 = vpack.c.bf16 %v1041_v63, %v1037_v61 }
 0xf00   :  { %v1606_v3 = vpop.eup %1605 }
 0xf01   :  { %787 = vrot.lane.b32.xlu0 %v1606_v3, %s1805_s11  ;;  %v1043_v3 = vld [vmem:[#allocation9 + $0x78] sm:$0xff] }
 0xf02   :  { %v1608_v5 = vpop.eup %1607 }
 0xf03   :  { %v781_v6 = vadd.f32 1.0, %v1608_v5  ;;  %v1540_v5 = vpack.c.bf16 %v1043_v3, %v1039_v2 }
 0xf05   :  { %1609 = vrcp.f32 %v781_v6  ;;  %v1036_v6 = vld [vmem:[#allocation9 + $0x40] sm:$0xff] }
 0xf0f   :  { %v1610_v13 = vpop.eup %1609 }
 0xf10   :  { %v785_v0 = vmul.f32 %v1610_v13, %v693_v55  ;;  %v1028_v55 = vld [vmem:[#allocation9] sm:$0xff] }
 0xf11   :  { %v1530_v58 = vpack.c.bf16 %v1032_v56, %v1028_v55 }
 0xf73   :  { %v788_v7 = vpop.permute.xlu0 %787 }
 0xf74   :  { %v790_v8 = vmul.f32 %v1610_v13, %v788_v7  ;;  %v1038_v7 = vld [vmem:[#allocation9 + $0x50] sm:$0xff] }
 0xf76   :  { %792 = vrot.lane.b32.xlu1 %v790_v8, %s1800_s17 }
 0xfe8   :  { %v793_v19 = vpop.permute.xlu1 %792 }
 0xfe9   :  { %v795_v9 = vadd.f32 %v793_v19, %v785_v0  ;;  %v1042_v0 = vld [vmem:[#allocation9 + $0x70] sm:$0xff] }
 0xfea   :  { %v1542_v19 = vpack.c.bf16 %v1042_v0, %v1038_v7 }
 0xfeb   :  { %1611 = vtanh.f32 %v795_v9 }
 0xff5   :  { %v1612_v10 = vpop.eup %1611 }
 0xff6   :  { %798 = vrot.lane.b32.xlu0 %v1612_v10, %s1805_s11 }
0x1068   :  { %v799_v11 = vpop.permute.xlu0 %798 }
0x1069   :  { %v801_v12 = vmul.f32 %v1610_v13, %v799_v11  ;;  %v1040_v13 = vld [vmem:[#allocation9 + $0x60] sm:$0xff] }
0x106a   :  { %v1534_v8 = vpack.c.bf16 %v1040_v13, %v1036_v6 }
0x106b   :  { %v802_v14 = vadd.f32 %v801_v12, %v700_v59  ;;  %805 = vrot.lane.b32.xlu1 %v801_v12, %s1800_s17  ;;  %v1030_v59 = vld [vmem:[#allocation9 + $0x10] sm:$0xff] }
0x106c   :  { %v1538_v62 = vpack.c.bf16 %v1034_v60, %v1030_v59 }
0x10dd   :  { %v806_v15 = vpop.permute.xlu1 %805 }
0x10de   :  { %1449 = vmatmul.mubr.msk.f32.vlgmr.msra.gmra.mrb[6].mxu0 %vm193_vm5, %v806_v15 }
0x10df   :  { %1135 = vmatprep.mubr.f32.mxu0 %v1803_v1  ;;  %1531 = vmatpush1.bf16.msra.mxu0 %v1530_v58 }
0x10e0   :  { %1533 = vmatprep.subr.bf16.mxu0 %v1532_v4 }
0x10e3   :  { %1535 = vmatpush1.bf16.msra.mxu0 %v1534_v8 }
0x11b1   :  { %v875_v17 = vpop.f32.mrb[6].mxu0 }
0x11b2   :  { %v879_v18 = vadd.f32 %v875_v17, %v803_v16  ;;  %v1450_v20 = vpop.f32.mrb[7].mxu0 }
0x11b4   :  { %1613 = vtanh.f32 %v879_v18  ;;  %v1300_v22 = vmul.f32 -1.442695, %v879_v18 }
0x11b6   :  { %1615 = vpow2.f32 %v1300_v22 }
0x11be   :  { %v1614_v21 = vpop.eup %1613 }
0x11bf   :  { %889 = vrot.lane.b32.xlu0 %v1614_v21, %s1805_s11 }
0x11c0   :  { %v1616_v23 = vpop.eup %1615 }
0x11c1   :  { %v883_v24 = vadd.f32 1.0, %v1616_v23 }
0x11c3   :  { %1617 = vrcp.f32 %v883_v24 }
0x11cd   :  { %v1618_v25 = vpop.eup %1617 }
0x11ce   :  { %v887_v28 = vmul.f32 %v1618_v25, %v795_v9 }
0x1231   :  { %v890_v26 = vpop.permute.xlu0 %889 }
0x1232   :  { %v892_v27 = vmul.f32 %v1618_v25, %v890_v26 }
0x1234   :  { %894 = vrot.lane.b32.xlu1 %v892_v27, %s1800_s17 }
0x12a6   :  { %v895_v29 = vpop.permute.xlu1 %894 }
0x12a7   :  { %v897_v30 = vadd.f32 %v895_v29, %v887_v28 }
0x12a9   :  { %1619 = vtanh.f32 %v897_v30 }
0x12b3   :  { %v1620_v31 = vpop.eup %1619 }
0x12b4   :  { %900 = vrot.lane.b32.xlu0 %v1620_v31, %s1805_s11 }
0x1326   :  { %v901_v32 = vpop.permute.xlu0 %900 }
0x1327   :  { %v903_v33 = vmul.f32 %v1618_v25, %v901_v32 }
0x1329   :  { %v904_v34 = vadd.f32 %v903_v33, %v802_v14  ;;  %907 = vrot.lane.b32.xlu1 %v903_v33, %s1800_s17 }
0x139b   :  { %v908_v35 = vpop.permute.xlu1 %907 }
0x139c   :  { %1460 = vmatmul.mubr.msk.f32.vlgmr.msra.gmra.mrb[8].mxu1 %vm193_vm5, %v908_v35 }
0x139d   :  { %1206 = vmatprep.mubr.f32.mxu1 %v1803_v1  ;;  %1539 = vmatpush1.bf16.msra.mxu1 %v1538_v62 }
0x139e   :  { %1541 = vmatprep.subr.bf16.mxu1 %v1540_v5 }
0x13a1   :  { %1543 = vmatpush1.bf16.msra.mxu1 %v1542_v19 }
0x146f   :  { %v977_v37 = vpop.f32.mrb[8].mxu1 }
0x1470   :  { %v981_v38 = vadd.f32 %v977_v37, %v905_v36  ;;  %v1461_v39 = vpop.f32.mrb[9].mxu1 }
0x1472   :  { %1621 = vtanh.f32 %v981_v38  ;;  %v1302_v41 = vmul.f32 -1.442695, %v981_v38 }
0x1474   :  { %1623 = vpow2.f32 %v1302_v41 }
0x147c   :  { %v1622_v40 = vpop.eup %1621 }
0x147d   :  { %991 = vrot.lane.b32.xlu0 %v1622_v40, %s1805_s11 }
0x147e   :  { %v1624_v42 = vpop.eup %1623 }
0x147f   :  { %v985_v43 = vadd.f32 1.0, %v1624_v42 }
0x1481   :  { %1625 = vrcp.f32 %v985_v43 }
0x148b   :  { %v1626_v44 = vpop.eup %1625 }
0x148c   :  { %v989_v47 = vmul.f32 %v1626_v44, %v897_v30 }
0x14ef   :  { %v992_v45 = vpop.permute.xlu0 %991 }
0x14f0   :  { %v994_v46 = vmul.f32 %v1626_v44, %v992_v45 }
0x14f2   :  { %996 = vrot.lane.b32.xlu1 %v994_v46, %s1800_s17 }
0x1564   :  { %v997_v1 = vpop.permute.xlu1 %996 }
0x1565   :  { %v999_v48 = vadd.f32 %v997_v1, %v989_v47 }
0x1567   :  { %1627 = vtanh.f32 %v999_v48 }
0x1571   :  { %v1628_v49 = vpop.eup %1627 }
0x1572   :  { %1002 = vrot.lane.b32.xlu0 %v1628_v49, %s1805_s11 }
0x15e4   :  { %v1003_v9 = vpop.permute.xlu0 %1002 }
0x15e5   :  { %v1005_v10 = vmul.f32 %v1626_v44, %v1003_v9 }
0x15e7   :  { %1008 = vrot.lane.b32.xlu0 %v1005_v10, %s1800_s17  ;;  %v1006_v11 = vadd.f32 %v1005_v10, %v904_v34 }
0x15e9   :  { %1067 = vrot.lane.b32.xlu1 %v1006_v11, %s1800_s17 }
0x15eb   :  { %1019 = vrot.lane.b32.xlu0 %v999_v48, %s1806_s2 }
0x15ed   :  { %1013 = vrot.lane.b32.xlu1 %v1005_v10, %s1807_s12 }
0x15f1   :  { %1023 = vrot.lane.b32.xlu1 %v999_v48, %s1808_s13 }
0x1659   :  { %v1009_v12 = vpop.permute.xlu0 %1008 }
0x165a   :  { %1012 = vst.msk [vmem:[#allocation12] sm:$0x3] %vm1011_vm6, %v1009_v12 }
0x165b   :  { %v1068_v14 = vpop.permute.xlu1 %1067 }
0x165c   :  { %1303 = vmatmul.mubr.msk.f32.vlgmr.msra.gmra.mrb[8].mxu0 %vm193_vm5, %v1068_v14  ;;  %1304 = vmatmul.mubr.msk.f32.vlgmr.msra.gmra.mrb[10].mxu1 %vm193_vm5, %v1068_v14 }
0x165d   :  { %v1020_v15 = vpop.permute.xlu0 %1019 }
0x165e   :  { %1022 = vst.msk [vmem:[#allocation14] sm:$0x3] %vm1011_vm6, %v1020_v15 }
0x165f   :  { %v1014_v16 = vpop.permute.xlu1 %1013 }
0x1660   :  { %1017 = vst.msk [vmem:[#allocation12 + $0x2] sm:$0x3] %vm1011_vm6, %v1014_v16 }
0x1663   :  { %v1024_v17 = vpop.permute.xlu1 %1023 }
0x1664   :  { %1027 = vst.msk [vmem:[#allocation14 + $0x2] sm:$0x3] %vm1011_vm6, %v1024_v17 }
0x1665   :  { %1728 = shalt.err (!%p1725_p8)
}
0x1666   :  { %s1729_s21 = scalar_lea.hbm %s2087_s7, 64 }
0x1667   :  { %p1730_p9 = scmp.ne.s32.totalorder %s2087_s7, %s1729_s21  ;;  %p1733_p10 = scmp.lt.u32.totalorder %s1729_s21, %s2087_s7 }
0x1669   :  { %p1735_p11 = pnand %p1733_p10, %p1730_p9 }
0x166b   :  { %1738 = shalt.err (!%p1735_p11)
}
0x166c   :  { %s1810_s24 = smov 2   ;;  %s1811_s27 = smov [#allocation14]  }
0x166d   :  { %1257 = dma.vmem_to_hbm [thread:$0]  %s1252_s15, 64, %s2087_s7, [#allocation13], %s1800_s17, %s1800_s17, %s1810_s24  }
0x166e   :  { %s1263_s29 = sshll.u32 %s1811_s27, 4  ;;  %s1264_s29 = int_to_ptr.vmem [resolvable:$true] %s1263_s29 }
0x166f   :  { %s1739_s1 = scalar_lea.vmem %s1264_s29, 64  ;;  %p1744_p13 = scmp.lt.s32.totalorder %s1264_s29, %s1264_s29 }
0x1670   :  { %p1740_p12 = scmp.ne.s32.totalorder %s1264_s29, %s1739_s1  ;;  %p1745_p0 = scmp.lt.s32.totalorder %s1739_s1, %s1739_s1 }
0x1672   :  { %p1746_p1 = por %p1745_p0, %p1744_p13 }
0x1674   :  { %p1747_p2 = pnand %p1746_p1, %p1740_p12 }
0x1676   :  { %1750 = shalt.err (!%p1747_p2)
}
0x1677   :  { %s1751_s18 = scalar_lea.hbm %s2088_s8, 64 }
0x1678   :  { %p1752_p3 = scmp.ne.s32.totalorder %s2088_s8, %s1751_s18  ;;  %p1755_p4 = scmp.lt.u32.totalorder %s1751_s18, %s2088_s8 }
0x167a   :  { %p1757_p5 = pnand %p1755_p4, %p1752_p3 }
0x167c   :  { %1760 = shalt.err (!%p1757_p5)
}
0x167d   :  { %1269 = dma.vmem_to_hbm [thread:$0]  %s1264_s29, 64, %s2088_s8, [#allocation13], %s1800_s17, %s1800_s17, %s1810_s24   ;;  %v1046_v18 = vlaneseq  ;;  %v1812_v25 = vmov 1983009808  }
0x167e   :  { %v1044_v23 = vld [vmem:[%s2085_s5] sm:$0xf]  ;;  %v1220_v26 = vunpack.c.l.s4 %v1812_v25  ;;  %s1813_s5 = smov [#allocation11]  }
0x167f   :  { %v1047_v20 = vshrl.u32 %v1046_v18, 7  ;;  %s1242_s8 = sshll.u32 %s1813_s5, 4  ;;  %s1243_s8 = int_to_ptr.vmem [resolvable:$true] %s1242_s8 }
0x1680   :  { %v1221_v31 = vunpack.c.0.s8 %v1220_v26  ;;  %s1761_s17 = scalar_lea.vmem %s1243_s8, 128  ;;  %p1766_p7 = scmp.lt.s32.totalorder %s1243_s8, %s1243_s8 }
0x1681   :  { %v1048_v21 = vsub.s32 0, %v1047_v20  ;;  %v1056_v22 = vsub.s32 2, %v1047_v20  ;;  %v1052_v24 = vsub.s32 1, %v1047_v20  ;;  %v1060_v27 = vsub.s32 3, %v1047_v20  ;;  %p1762_p6 = scmp.ne.s32.totalorder %s1243_s8, %s1761_s17  ;;  %p1767_p8 = scmp.lt.s32.totalorder %s1761_s17, %s1761_s17 }
0x1682   :  { %v1224_v40 = vsub.s32 %v1221_v31, %v1047_v20 }
0x1683   :  { %v1049_v28 = vrot.slane %v1044_v23, %v1048_v21  ;;  %v1057_v29 = vrot.slane %v1044_v23, %v1056_v22  ;;  %v1053_v30 = vrot.slane %v1044_v23, %v1052_v24  ;;  %v1061_v32 = vrot.slane %v1044_v23, %v1060_v27  ;;  %p1768_p9 = por %p1767_p8, %p1766_p7 }
0x1685   :  { %p1769_p10 = pnand %p1768_p9, %p1762_p6 }
0x172f   :  { %v1137_v33 = vpop.f32.mrb[8].mxu0  ;;  %v1208_v34 = vpop.f32.mrb[10].mxu1 }
0x1730   :  { %v1138_v35 = vadd.f32 %v1137_v33, %v1049_v28  ;;  %v1209_v36 = vadd.f32 %v1208_v34, %v1057_v29  ;;  %v1139_v37 = vpop.f32.mrb[9].mxu0  ;;  %v1210_v38 = vpop.f32.mrb[11].mxu1 }
0x1731   :  { %v1140_v39 = vadd.f32 %v1139_v37, %v1053_v30  ;;  %v1211_v41 = vadd.f32 %v1210_v38, %v1061_v32 }
0x1733   :  { %v1217_v42 = vcombine.low %v1138_v35, %v1140_v39  ;;  %v1218_v43 = vcombine.low %v1209_v36, %v1211_v41 }
0x1735   :  { %v1225_v44 = vrot.slane %v1217_v42, %v1224_v40  ;;  %v1232_v45 = vrot.slane %v1218_v43, %v1224_v40 }
0x1737   :  { %v1233_v46 = vcombine.low %v1225_v44, %v1232_v45 }
0x1739   :  { %1235 = vst [vmem:[#allocation11] sm:$0xff] %v1233_v46 }
0x173a   :  { %1772 = shalt.err (!%p1769_p10)
}
0x173b   :  { %s1773_s16 = scalar_lea.hbm %s2086_s6, 128 }
0x173c   :  { %p1774_p11 = scmp.ne.s32.totalorder %s2086_s6, %s1773_s16  ;;  %p1777_p12 = scmp.lt.u32.totalorder %s1773_s16, %s2086_s6 }
0x173e   :  { %p1779_p13 = pnand %p1777_p12, %p1774_p11 }
0x1740   :  { %1782 = shalt.err (!%p1779_p13)
}
0x1741   :  { %1245 = dma.vmem_to_hbm [thread:$0]  %s1243_s8, 128, %s2086_s6, [#allocation5]  }
0x1742   :  { %1789 = dma.done.wait [#allocation5], 128  }
0x1743   :  { %1790 = vsyncadd [#allocation5], 4294967168 }
0x1744   :  { %1791 = dma.done.wait [#allocation13], 128  }
0x1745   :  { %1792 = vsyncadd [#allocation13], 4294967168 }
0x1746   :  { %1279 = vsyncpa [#allocation4], 1 }
0x1747   :  { %1280 = vsyncpa [#allocation7], 1 }
0x1748   :  { %1281 = vsyncpa [#allocation10], 1 }
0x1749   :  { %1282 = vsyncpa [#allocation5], 1 }
0x174a   :  { %1283 = vsyncpa [#allocation13], 1 }

</bundles_post_ra>
